<compile_context>
chip_gen: v7x
topology: tpu7x:2x2x1
jax: 0.10.0
libtpu: 0.0.40
codegen_flags: <defaults>
</compile_context>

<pallas_src>
import functools
import math

import jax
import jax.numpy as jnp
from jax.experimental import pallas as pl
from jax.experimental.pallas import tpu as pltpu


_SQRT_2_OVER_PI = math.sqrt(2.0 / math.pi)


def _gelu_new(x):
    # GPT-2 "new" GELU: 0.5*x*(1+tanh(sqrt(2/pi)*(x+0.044715*x^3)))
    return 0.5 * x * (1.0 + jnp.tanh(_SQRT_2_OVER_PI * (x + 0.044715 * x * x * x)))


# ----------------------------------------------------------------------------- kernels
def _ffn_resident_kernel(x_ref, w1_ref, b1_ref, w2_ref, b2_ref, o_ref):
    """Weights fully resident in VMEM. Grid = (M tiles,). No scratch accumulator."""
    # mlp_1: native-dtype MXU feed, f32 accumulation.
    h = jnp.dot(x_ref[...], w1_ref[...], preferred_element_type=jnp.float32)
    h = h + b1_ref[...].astype(jnp.float32)
    # gelu_new in f32 (VPU/EUP).
    g = _gelu_new(h)
    # mlp_2 + output bias.
    acc = jnp.dot(g.astype(w2_ref.dtype), w2_ref[...],
                  preferred_element_type=jnp.float32)
    acc = acc + b2_ref[...].astype(jnp.float32)
    # dropout: eval mode -> identity
    o_ref[...] = acc.astype(o_ref.dtype)


def _ffn_streamed_kernel(x_ref, w1_ref, b1_ref, w2_ref, b2_ref, o_ref, acc_ref):
    """Weights streamed over an I ("arbitrary", last) grid axis; f32 accumulator."""
    i = pl.program_id(1)

    @pl.when(i == 0)
    def _init():
        # Fold the output bias into the accumulator once (not per reduction step).
        acc_ref[...] = jnp.broadcast_to(
            b2_ref[...].astype(jnp.float32), acc_ref.shape)

    h = jnp.dot(x_ref[...], w1_ref[...], preferred_element_type=jnp.float32)
    h = h + b1_ref[...].astype(jnp.float32)
    g = _gelu_new(h)
    acc_ref[...] += jnp.dot(g.astype(w2_ref.dtype), w2_ref[...],
                            preferred_element_type=jnp.float32)

    @pl.when(i == pl.num_programs(1) - 1)
    def _finalize():
        # dropout: eval mode -> identity
        o_ref[...] = acc_ref[...].astype(o_ref.dtype)


# ----------------------------------------------------------------------------- helpers
def _round_up(v, m):
    return ((v + m - 1) // m) * m


def _pick_reduction_tile(dim, target, mult):
    """Largest multiple-of-`mult` divisor of `dim` that is <= target, else `dim`."""
    if dim <= target:
        return dim
    t = (target // mult) * mult
    while t >= mult:
        if dim % t == 0:
            return t
        t -= mult
    return dim


def _vmem_capacity_bytes():
    try:
        return int(pltpu.get_tpu_info().vmem_capacity_bytes)
    except Exception:
        return 64 << 20  # conservative: v7x per-TensorCore VMEM


def _pad_last(a, new_last):
    if a.shape[-1] == new_last:
        return a
    pad = [(0, 0)] * (a.ndim - 1) + [(0, new_last - a.shape[-1])]
    return jnp.pad(a, pad)


def _pad_first(a, new_first):
    if a.shape[0] == new_first:
        return a
    pad = [(0, new_first - a.shape[0])] + [(0, 0)] * (a.ndim - 1)
    return jnp.pad(a, pad)


# ----------------------------------------------------------------------------- wrapper
@functools.partial(jax.jit, static_argnames=("compute_dtype", "_force_streamed"))
def feed_forward(x, w1, b1, w2, b2, *, compute_dtype=None, _force_streamed=False):
    """x: (B, S, H). w1: (H, I), b1: (1, I), w2: (I, H), b2: (1, H). Returns (B, S, H)."""
    B, S, H = x.shape
    I = w1.shape[1]
    M = B * S
    out_dtype = x.dtype
    cd = jnp.dtype(compute_dtype) if compute_dtype is not None else x.dtype

    # ---- padding to lane-dense (multiple-of-128) feature dims -----------------
    Hp = _round_up(H, 128)
    Ip = _round_up(I, 128)

    x2d = _pad_last(x.reshape(M, H).astype(cd), Hp)
    w1p = _pad_last(_pad_first(w1.astype(cd), Hp), Ip)   # (Hp, Ip), zero padding
    b1p = _pad_last(b1, Ip)                              # (1, Ip)  (gelu(0)=0 -> safe)
    w2p = _pad_last(_pad_first(w2.astype(cd), Ip), Hp)   # (Ip, Hp)
    b2p = _pad_last(b2, Hp)                              # (1, Hp)

    isz = jnp.dtype(cd).itemsize
    wsz = isz
    osz = jnp.dtype(out_dtype).itemsize
    cap = _vmem_capacity_bytes()

    # ---- M tile: big for arithmetic intensity, >=2 tiles when possible (v7x) --
    if M <= 8:
        tm = M
    elif M >= 1024:
        tm = 512
    else:
        tm = min(512, max(8, _round_up(pl.cdiv(M, 2), 8)))
    n_m_tiles = pl.cdiv(M, tm)

    # ---- resident-weights feasibility (weights DMA'd once, reused per M tile) -
    resident_est = (
        2 * (Hp * Ip + Ip * Hp + Ip + Hp) * wsz     # weights + biases (x2 buffers)
        + 2 * tm * Hp * (isz + osz)                 # x / out tiles (double-buffered)
        + 2 * tm * Ip * 4                           # f32 h/g temporaries headroom
    )
    use_resident = (not _force_streamed) and (resident_est <= int(0.70 * cap))

    if use_resident:
        grid = (n_m_tiles,)
        in_specs = [
            pl.BlockSpec((tm, Hp), lambda m: (m, 0)),   # x tile
            pl.BlockSpec((Hp, Ip), lambda m: (0, 0)),   # W1 (resident)
            pl.BlockSpec((1, Ip), lambda m: (0, 0)),    # b1
            pl.BlockSpec((Ip, Hp), lambda m: (0, 0)),   # W2 (resident)
            pl.BlockSpec((1, Hp), lambda m: (0, 0)),    # b2
        ]
        out_specs = pl.BlockSpec((tm, Hp), lambda m: (m, 0))
        scratch_shapes = []
        kernel = _ffn_resident_kernel
        dim_sem = ("parallel",)
        weight_reads = 1
        vmem_limit = int(min(max(resident_est * 1.25 + (4 << 20), 16 << 20),
                             0.85 * cap))
    else:
        # ---- streamed weights: tile the I (reduction) axis, generation-aware --
        ti_target = 512 if cap <= (64 << 20) else 1024
        ti = _pick_reduction_tile(Ip, ti_target, 128)

        def est(tm_, ti_):
            return (2 * (tm_ * Hp * isz + Hp * ti_ * wsz + ti_ * wsz
                         + ti_ * Hp * wsz + Hp * wsz + tm_ * Hp * osz)
                    + tm_ * Hp * 4            # f32 accumulator scratch
                    + 2 * tm_ * ti_ * 4)      # f32 h/g temporaries headroom

        budget = int(0.80 * cap)
        while est(tm, ti) > budget and ti > 128:
            new_ti = _pick_reduction_tile(Ip, max(128, ti // 2), 128)
            if new_ti >= ti:
                break
            ti = new_ti
        while est(tm, ti) > budget and tm > 128:
            tm = max(128, tm // 2)
        n_m_tiles = pl.cdiv(M, tm)

        grid = (n_m_tiles, Ip // ti)
        in_specs = [
            pl.BlockSpec((tm, Hp), lambda m, i: (m, 0)),   # x tile
            pl.BlockSpec((Hp, ti), lambda m, i: (0, i)),   # W1 I-tile (streamed)
            pl.BlockSpec((1, ti), lambda m, i: (0, i)),    # b1 I-tile
            pl.BlockSpec((ti, Hp), lambda m, i: (i, 0)),   # W2 I-tile (streamed)
            pl.BlockSpec((1, Hp), lambda m, i: (0, 0)),    # b2
        ]
        out_specs = pl.BlockSpec((tm, Hp), lambda m, i: (m, 0))
        scratch_shapes = [pltpu.VMEM((tm, Hp), jnp.float32)]
        kernel = _ffn_streamed_kernel
        dim_sem = ("parallel", "arbitrary")
        weight_reads = n_m_tiles
        vmem_limit = int(min(max(est(tm, ti) * 1.25 + (4 << 20), 16 << 20),
                             0.85 * cap))

    # ---- advisory cost estimate (weight re-reads included) ---------------------
    cost = pl.CostEstimate(
        flops=2 * M * Hp * Ip * 2,                      # two matmuls
        transcendentals=M * Ip,                         # tanh in gelu_new
        bytes_accessed=int(M * Hp * isz                 # read x
                           + weight_reads * (Hp * Ip + Ip * Hp) * wsz
                           + (Ip + Hp) * 4              # biases
                           + M * Hp * osz),             # write out
    )

    out2d = pl.pallas_call(
        kernel,
        out_shape=jax.ShapeDtypeStruct((M, Hp), out_dtype),
        grid_spec=pltpu.PrefetchScalarGridSpec(
            num_scalar_prefetch=0,
            grid=grid,
            in_specs=in_specs,
            out_specs=out_specs,
            scratch_shapes=scratch_shapes,
        ),
        compiler_params=pltpu.CompilerParams(
            dimension_semantics=dim_sem,
            vmem_limit_bytes=vmem_limit,
        ),
        cost_estimate=cost,
    )(x2d, w1p, b1p, w2p, b2p)

    if Hp != H:
        out2d = out2d[:, :H]
    return out2d.reshape(B, S, H)


# ----------------------------------------------------------------------------- reference
def _reference(x, w1, b1, w2, b2):
    h = x.astype(jnp.float32) @ w1.astype(jnp.float32) + b1[0].astype(jnp.float32)
    g = _gelu_new(h)
    return (g @ w2.astype(jnp.float32) + b2[0].astype(jnp.float32)).astype(x.dtype)


if __name__ == "__main__":
    # config: hidden_dim=32, intermediate_dim=128, drop_rate=0.1 (eval -> identity)
    B, S, H, I = 2, 8, 32, 128

    key = jax.random.PRNGKey(0)
    kx, k1, k2, k3, k4 = jax.random.split(key, 5)

    x = jax.random.normal(kx, (B, S, H), dtype=jnp.float32)

    # Deterministic "Linear"-like init (uniform in +/- 1/sqrt(fan_in)), stored as (in, out).
    lim1 = 1.0 / math.sqrt(H)
    w1 = jax.random.uniform(k1, (H, I), minval=-lim1, maxval=lim1, dtype=jnp.float32)
    b1 = jax.random.uniform(k2, (1, I), minval=-lim1, maxval=lim1, dtype=jnp.float32)
    lim2 = 1.0 / math.sqrt(I)
    w2 = jax.random.uniform(k3, (I, H), minval=-lim2, maxval=lim2, dtype=jnp.float32)
    b2 = jax.random.uniform(k4, (1, H), minval=-lim2, maxval=lim2, dtype=jnp.float32)

    y_ref = _reference(x.reshape(B * S, H), w1, b1, w2, b2).reshape(B, S, H)

    # 1) f32 operands, auto path (weights resident in VMEM).
    y = jax.block_until_ready(feed_forward(x, w1, b1, w2, b2))
    assert y.shape == (B, S, H)
    assert jnp.allclose(y, y_ref, atol=1e-5, rtol=1e-5), "f32 resident mismatch"

    # 2) bf16 compute dtype (MXU fast path, f32 accumulation) -> looser tolerance.
    y_bf = jax.block_until_ready(
        feed_forward(x, w1, b1, w2, b2, compute_dtype="bfloat16"))
    assert jnp.allclose(y_bf, y_ref, atol=5e-2, rtol=5e-2), "bf16 resident mismatch"

    # 3) larger intermediate dim + forced streaming -> exercises the accumulator path.
    I2 = 2048
    lim2b = 1.0 / math.sqrt(I2)
    w1b = jax.random.uniform(k1, (H, I2), minval=-lim1, maxval=lim1, dtype=jnp.float32)
    b1b = jax.random.uniform(k2, (1, I2), minval=-lim1, maxval=lim1, dtype=jnp.float32)
    w2b = jax.random.uniform(k3, (I2, H), minval=-lim2b, maxval=lim2b, dtype=jnp.float32)
    b2b = jax.random.uniform(k4, (1, H), minval=-lim2b, maxval=lim2b, dtype=jnp.float32)
    y2 = jax.block_until_ready(
        feed_forward(x, w1b, b1b, w2b, b2b, _force_streamed=True))
    y2_ref = _reference(x.reshape(B * S, H), w1b, b1b, w2b, b2b).reshape(B, S, H)
    assert jnp.allclose(y2, y2_ref, atol=1e-4, rtol=1e-4), "f32 streamed mismatch"

    print("KERNEL_OK")
</pallas_src>

<mosaic_0001>
module attributes {stable_mosaic.version = 11 : i64} {
  func.func @_ffn_resident_kernel(%arg0: i32, %arg1: memref<8x128xf32, #tpu.memory_space<vmem>>, %arg2: memref<128x128xf32, #tpu.memory_space<vmem>>, %arg3: memref<1x128xf32, #tpu.memory_space<vmem>>, %arg4: memref<128x128xf32, #tpu.memory_space<vmem>>, %arg5: memref<1x128xf32, #tpu.memory_space<vmem>>, %arg6: memref<8x128xf32, #tpu.memory_space<vmem>>) attributes {dimension_semantics = [#tpu.dimension_semantics<parallel>], iteration_bounds = array<i64: 2>, scalar_prefetch = 0 : i64, scratch_operands = 0 : i64, tpu.core_type = #tpu.core_type<tc>, window_params = [{transform_indices = @transform_0, window_bounds = array<i64: 8, 128>}, {pipeline_mode = #tpu.pipeline_mode<synchronous>, transform_indices = @transform_1, window_bounds = array<i64: 128, 128>}, {pipeline_mode = #tpu.pipeline_mode<synchronous>, transform_indices = @transform_2, window_bounds = array<i64: 1, 128>}, {pipeline_mode = #tpu.pipeline_mode<synchronous>, transform_indices = @transform_3, window_bounds = array<i64: 128, 128>}, {pipeline_mode = #tpu.pipeline_mode<synchronous>, transform_indices = @transform_4, window_bounds = array<i64: 1, 128>}, {transform_indices = @transform_5, window_bounds = array<i64: 8, 128>}]} {
    %c0 = arith.constant 0 : index
    %c0_0 = arith.constant 0 : index
    %0 = vector.load %arg1[%c0, %c0_0] : memref<8x128xf32, #tpu.memory_space<vmem>>, vector<8x128xf32>
    %c0_1 = arith.constant 0 : index
    %c0_2 = arith.constant 0 : index
    %1 = vector.load %arg2[%c0_1, %c0_2] : memref<128x128xf32, #tpu.memory_space<vmem>>, vector<128x128xf32>
    %cst = arith.constant dense<0.000000e+00> : vector<8x128xf32>
    %2 = tpu.matmul %0, %1, %cst {dimension_numbers = #tpu.dot_dimension_numbers<[1], [0], [0], [1], [0, 0, 1, 1], [], []>} : vector<8x128xf32>, vector<128x128xf32>, vector<8x128xf32> -> vector<8x128xf32>
    %c0_3 = arith.constant 0 : index
    %c0_4 = arith.constant 0 : index
    %3 = vector.load %arg3[%c0_3, %c0_4] : memref<1x128xf32, #tpu.memory_space<vmem>>, vector<1x128xf32>
    %4 = vector.broadcast %3 : vector<1x128xf32> to vector<8x128xf32>
    %5 = arith.addf %2, %4 : vector<8x128xf32>
    %cst_5 = arith.constant 5.000000e-01 : f32
    %6 = vector.broadcast %cst_5 : f32 to vector<8x128xf32>
    %7 = arith.mulf %6, %5 : vector<8x128xf32>
    %cst_6 = arith.constant 4.471500e-02 : f32
    %8 = vector.broadcast %cst_6 : f32 to vector<8x128xf32>
    %9 = arith.mulf %8, %5 : vector<8x128xf32>
    %10 = arith.mulf %9, %5 : vector<8x128xf32>
    %11 = arith.mulf %10, %5 : vector<8x128xf32>
    %12 = arith.addf %5, %11 : vector<8x128xf32>
    %cst_7 = arith.constant 0.797884583 : f32
    %13 = vector.broadcast %cst_7 : f32 to vector<8x128xf32>
    %14 = arith.mulf %13, %12 : vector<8x128xf32>
    %15 = math.tanh %14 : vector<8x128xf32>
    %cst_8 = arith.constant 1.000000e+00 : f32
    %16 = vector.broadcast %cst_8 : f32 to vector<8x128xf32>
    %17 = arith.addf %16, %15 : vector<8x128xf32>
    %18 = arith.mulf %7, %17 : vector<8x128xf32>
    %c0_9 = arith.constant 0 : index
    %c0_10 = arith.constant 0 : index
    %19 = vector.load %arg4[%c0_9, %c0_10] : memref<128x128xf32, #tpu.memory_space<vmem>>, vector<128x128xf32>
    %cst_11 = arith.constant dense<0.000000e+00> : vector<8x128xf32>
    %20 = tpu.matmul %18, %19, %cst_11 {dimension_numbers = #tpu.dot_dimension_numbers<[1], [0], [0], [1], [0, 0, 1, 1], [], []>} : vector<8x128xf32>, vector<128x128xf32>, vector<8x128xf32> -> vector<8x128xf32>
    %c0_12 = arith.constant 0 : index
    %c0_13 = arith.constant 0 : index
    %21 = vector.load %arg5[%c0_12, %c0_13] : memref<1x128xf32, #tpu.memory_space<vmem>>, vector<1x128xf32>
    %22 = vector.broadcast %21 : vector<1x128xf32> to vector<8x128xf32>
    %23 = arith.addf %20, %22 : vector<8x128xf32>
    %c0_14 = arith.constant 0 : index
    %c0_15 = arith.constant 0 : index
    %24 = vector.load %arg6[%c0_14, %c0_15] : memref<8x128xf32, #tpu.memory_space<vmem>>, vector<8x128xf32>
    tpu.vector_store %arg6[%c0_14, %c0_15], %23 {strides = array<i32>} : memref<8x128xf32, #tpu.memory_space<vmem>>, vector<8x128xf32>,
    return
  }
  func.func @transform_0(%arg0: i32) -> (i32, i32) {
    %c0_i32 = arith.constant 0 : i32
    %c0_i32_0 = arith.constant 0 : i32
    return %arg0, %c0_i32 : i32, i32
  }
  func.func @transform_1(%arg0: i32) -> (i32, i32) {
    %c0_i32 = arith.constant 0 : i32
    %c0_i32_0 = arith.constant 0 : i32
    %c0_i32_1 = arith.constant 0 : i32
    return %c0_i32, %c0_i32_0 : i32, i32
  }
  func.func @transform_2(%arg0: i32) -> (i32, i32) {
    %c0_i32 = arith.constant 0 : i32
    %c0_i32_0 = arith.constant 0 : i32
    %c0_i32_1 = arith.constant 0 : i32
    return %c0_i32, %c0_i32_0 : i32, i32
  }
  func.func @transform_3(%arg0: i32) -> (i32, i32) {
    %c0_i32 = arith.constant 0 : i32
    %c0_i32_0 = arith.constant 0 : i32
    %c0_i32_1 = arith.constant 0 : i32
    return %c0_i32, %c0_i32_0 : i32, i32
  }
  func.func @transform_4(%arg0: i32) -> (i32, i32) {
    %c0_i32 = arith.constant 0 : i32
    %c0_i32_0 = arith.constant 0 : i32
    %c0_i32_1 = arith.constant 0 : i32
    return %c0_i32, %c0_i32_0 : i32, i32
  }
  func.func @transform_5(%arg0: i32) -> (i32, i32) {
    %c0_i32 = arith.constant 0 : i32
    %c0_i32_0 = arith.constant 0 : i32
    return %arg0, %c0_i32 : i32, i32
  }
}

</mosaic_0001>

<bundles_post_ra>
// kernel: feed_forward.1
= control target key start
LH: loop header
LB: loop body
LE: loop exit
PB: predicated region body
PF: predicated region fallthrough
CT: control target
= control target key end

     0   :  { %s687_s18 = smov 0   ;;  %s833_s0 = inlined_call_operand.vmem [shape: f32[16,128], index: 0, kind: input, shape index: {}]   ;;  %s834_s1 = inlined_call_operand.vmem [shape: f32[128,128], index: 1, kind: input, shape index: {}]   ;;  %s835_s2 = inlined_call_operand.vmem [shape: f32[1,128], index: 2, kind: input, shape index: {}]   ;;  %s836_s3 = inlined_call_operand.vmem [shape: f32[128,128], index: 3, kind: input, shape index: {}]   ;;  %s837_s4 = inlined_call_operand.vmem [shape: f32[1,128], index: 4, kind: input, shape index: {}]   ;;  %s838_s5 = inlined_call_operand.vmem [shape: f32[16,128], index: 5, kind: output, shape index: {}]  }
   0x1 LB: > { %s470_s19 = sadd.s32 4294967295, %s652_s18   ;;  %p474_p0 = scmp.ge.s32.totalorder %s652_s18, 1  ;;  %s652_s18 = sphi %s687_s18, %s15_s18  }
   0x2   : > { %p186_p1 = scmp.lt.s32.totalorder %s652_s18, 3 }
   0x4   : > { %p187_p2 = pnand %p474_p0, %p186_p1 }
   0x5   : > { %v221_v0 = vld [vmem:[%s834_s1] sm:$0xff] (!%p187_p2)  ;;  %v222_v1 = vld [vmem:[%s834_s1 + $0x8] sm:$0xff] (!%p187_p2)  ;;  %v223_v2 = vld [vmem:[%s834_s1 + $0x10] sm:$0xff] (!%p187_p2)  ;;  %v654_v3 = vmov (!%p187_p2), 0.0|0.0   ;;  %vm655_vm0 = vmmov (!%p187_p2), 0   ;;  %v656_v6 = vmov (!%p187_p2), 0.0  }
   0x6   : > { %190 = sbr.rel (%p187_p2) target bundleno = 493 (0x1ed), region = 40  ;;  %585 = vmatprep.subr.bf16.mxu0 (!%p187_p2), %v654_v3  ;;  %v586_v4 = vpack.c.bf16 (!%p187_p2), %v222_v1, %v221_v0  ;;  %v224_v5 = vld [vmem:[%s834_s1 + $0x18] sm:$0xff] (!%p187_p2)  ;;  %547 = vmatprep.mubr.msk.f32.mxu0 (!%p187_p2), %vm655_vm0, %v656_v6  ;;  %v225_v8 = vld [vmem:[%s834_s1 + $0x20] sm:$0xff] (!%p187_p2)  ;;  %v226_v9 = vld [vmem:[%s834_s1 + $0x28] sm:$0xff] (!%p187_p2)  ;;  %p212_p3 = scmp.lt.s32.totalorder (!%p187_p2), %s470_s19, 1 }
   0x7   : > { %609 = vmatprep.subr.bf16.mxu1 (!%p187_p2), %v654_v3  ;;  %582 = vmatprep.mubr.msk.f32.mxu1 (!%p187_p2), %vm655_vm0, %v656_v6  ;;  %v589_v7 = vpack.c.bf16 (!%p187_p2), %v224_v5, %v223_v2  ;;  %v323_v10 = vld [vmem:[%s836_s3] sm:$0xff] (!%p187_p2)  ;;  %v324_v11 = vld [vmem:[%s836_s3 + $0x8] sm:$0xff] (!%p187_p2)  ;;  %v592_v13 = vpack.c.bf16 (!%p187_p2), %v226_v9, %v225_v8  ;;  %v227_v14 = vld [vmem:[%s834_s1 + $0x30] sm:$0xff] (!%p187_p2) }
   0x8   : > { %587 = vmatpush3.bf16.msra.mxu0 (!%p187_p2), %v586_v4  ;;  %v610_v12 = vpack.c.bf16 (!%p187_p2), %v324_v11, %v323_v10  ;;  %v228_v15 = vld [vmem:[%s834_s1 + $0x38] sm:$0xff] (!%p187_p2)  ;;  %v229_v17 = vld [vmem:[%s834_s1 + $0x40] sm:$0xff] (!%p187_p2)  ;;  %v230_v18 = vld [vmem:[%s834_s1 + $0x48] sm:$0xff] (!%p187_p2) }
   0x9   : > { %588 = vmatprep.subr.bf16.mxu0 (!%p187_p2), %v654_v3  ;;  %v595_v16 = vpack.c.bf16 (!%p187_p2), %v228_v15, %v227_v14  ;;  %v598_v19 = vpack.c.bf16 (!%p187_p2), %v230_v18, %v229_v17  ;;  %v231_v20 = vld [vmem:[%s834_s1 + $0x50] sm:$0xff] (!%p187_p2)  ;;  %v232_v21 = vld [vmem:[%s834_s1 + $0x58] sm:$0xff] (!%p187_p2)  ;;  %v233_v23 = vld [vmem:[%s834_s1 + $0x60] sm:$0xff] (!%p187_p2) }
   0xa   : > { %611 = vmatpush3.bf16.msra.mxu1 (!%p187_p2), %v610_v12  ;;  %v601_v22 = vpack.c.bf16 (!%p187_p2), %v232_v21, %v231_v20  ;;  %v234_v24 = vld [vmem:[%s834_s1 + $0x68] sm:$0xff] (!%p187_p2)  ;;  %v235_v26 = vld [vmem:[%s834_s1 + $0x70] sm:$0xff] (!%p187_p2)  ;;  %v236_v27 = vld [vmem:[%s834_s1 + $0x78] sm:$0xff] (!%p187_p2) }
   0xb   : > { %612 = vmatprep.subr.bf16.mxu1 (!%p187_p2), %v654_v3  ;;  %v604_v25 = vpack.c.bf16 (!%p187_p2), %v234_v24, %v233_v23  ;;  %v607_v28 = vpack.c.bf16 (!%p187_p2), %v236_v27, %v235_v26  ;;  %v325_v30 = vld [vmem:[%s836_s3 + $0x10] sm:$0xff] (!%p187_p2)  ;;  %v326_v31 = vld [vmem:[%s836_s3 + $0x18] sm:$0xff] (!%p187_p2)  ;;  %v327_v33 = vld [vmem:[%s836_s3 + $0x20] sm:$0xff] (!%p187_p2) }
   0xc   : > { %590 = vmatpush3.bf16.msra.mxu0 (!%p187_p2), %v589_v7  ;;  %v613_v32 = vpack.c.bf16 (!%p187_p2), %v326_v31, %v325_v30  ;;  %v328_v34 = vld [vmem:[%s836_s3 + $0x28] sm:$0xff] (!%p187_p2)  ;;  %v329_v36 = vld [vmem:[%s836_s3 + $0x30] sm:$0xff] (!%p187_p2)  ;;  %v330_v37 = vld [vmem:[%s836_s3 + $0x38] sm:$0xff] (!%p187_p2) }
   0xd   : > { %591 = vmatprep.subr.bf16.mxu0 %v654_v3  ;;  %s840_s19 = smov (!%p212_p3, %s470_s19), 1  ;;  %v616_v35 = vpack.c.bf16 %v328_v34, %v327_v33  ;;  %v619_v38 = vpack.c.bf16 %v330_v37, %v329_v36  ;;  %v331_v39 = vld [vmem:[%s836_s3 + $0x40] sm:$0xff]  ;;  %v332_v40 = vld [vmem:[%s836_s3 + $0x48] sm:$0xff]  ;;  %v333_v42 = vld [vmem:[%s836_s3 + $0x50] sm:$0xff] }
   0xe   : > { %s475_s8 = sshll.u32 %s840_s19, 3  ;;  %614 = vmatpush3.bf16.msra.mxu1 %v613_v32  ;;  %v622_v41 = vpack.c.bf16 %v332_v40, %v331_v39  ;;  %v334_v43 = vld [vmem:[%s836_s3 + $0x58] sm:$0xff]  ;;  %v335_v45 = vld [vmem:[%s836_s3 + $0x60] sm:$0xff]  ;;  %v336_v46 = vld [vmem:[%s836_s3 + $0x68] sm:$0xff] }
   0xf   : > { %s215_s11 = scalar_lea.vmem %s833_s0, %s475_s8  ;;  %615 = vmatprep.subr.bf16.mxu1 %v654_v3  ;;  %v625_v44 = vpack.c.bf16 %v334_v43, %v333_v42  ;;  %v628_v47 = vpack.c.bf16 %v336_v46, %v335_v45  ;;  %v337_v48 = vld [vmem:[%s836_s3 + $0x70] sm:$0xff]  ;;  %v338_v49 = vld [vmem:[%s836_s3 + $0x78] sm:$0xff]  ;;  %v477_v51 = vld [vmem:[%s835_s2] ss:$0 sm:$0xff]  ;;  %s219_s26 = scalar_lea.vmem %s838_s5, %s475_s8 }
  0x10   : > { %593 = vmatpush3.bf16.msra.mxu0 %v592_v13  ;;  %v220_v29 = vld [vmem:[%s215_s11] sm:$0xff]  ;;  %v631_v50 = vpack.c.bf16 %v338_v49, %v337_v48 }
  0x11   : > { %594 = vmatprep.subr.bf16.mxu0 %v654_v3  ;;  %v478_v0 = vld [vmem:[%s837_s4] ss:$0 sm:$0xff] }
  0x12   : > { %617 = vmatpush3.bf16.msra.mxu1 %v616_v35 }
  0x13   : > { %618 = vmatprep.subr.bf16.mxu1 %v654_v3 }
  0x14   : > { %596 = vmatpush3.bf16.msra.mxu0 %v595_v16 }
  0x15   : > { %597 = vmatprep.subr.bf16.mxu0 %v654_v3 }
  0x16   : > { %620 = vmatpush3.bf16.msra.mxu1 %v619_v38 }
  0x17   : > { %621 = vmatprep.subr.bf16.mxu1 %v654_v3 }
  0x18   : > { %599 = vmatpush3.bf16.msra.mxu0 %v598_v19 }
  0x19   : > { %600 = vmatprep.subr.bf16.mxu0 %v654_v3 }
  0x1a   : > { %623 = vmatpush3.bf16.msra.mxu1 %v622_v41 }
  0x1b   : > { %624 = vmatprep.subr.bf16.mxu1 %v654_v3 }
  0x1c   : > { %602 = vmatpush3.bf16.msra.mxu0 %v601_v22 }
  0x1d   : > { %603 = vmatprep.subr.bf16.mxu0 %v654_v3 }
  0x1e   : > { %626 = vmatpush3.bf16.msra.mxu1 %v625_v44 }
  0x1f   : > { %627 = vmatprep.subr.bf16.mxu1 %v654_v3 }
  0x20   : > { %605 = vmatpush3.bf16.msra.mxu0 %v604_v25 }
  0x21   : > { %606 = vmatprep.subr.bf16.mxu0 %v654_v3 }
  0x22   : > { %629 = vmatpush3.bf16.msra.mxu1 %v628_v47 }
  0x23   : > { %630 = vmatprep.subr.bf16.mxu1 %v654_v3 }
  0x24   : > { %608 = vmatpush3.bf16.msra.mxu0 %v607_v28 }
  0x26   : > { %632 = vmatpush3.bf16.msra.mxu1 %v631_v50 }
  0x27   : > { %548 = vmatmul.mubr.f32.vlgmr.msra.gmra.mrb[0].mxu0 %v220_v29 }
  0xfa   : > { %v310_v52 = vpop.f32.mrb[0].mxu0 }
  0xfb   : > { %v311_v53 = vadd.f32 %v477_v51, %v310_v52  ;;  %v549_v54 = vpop.f32.mrb[1].mxu0 }
  0xfd   : > { %v315_v55 = vmul.f32 0.044715, %v311_v53  ;;  %v314_v61 = vmul.f32 0.5, %v311_v53 }
  0xff   : > { %v316_v56 = vmul.f32 %v315_v55, %v311_v53 }
 0x101   : > { %v317_v57 = vmul.f32 %v316_v56, %v311_v53 }
 0x103   : > { %v318_v58 = vadd.f32 %v317_v57, %v311_v53 }
 0x105   : > { %v319_v59 = vmul.f32 0.7978846, %v318_v58 }
 0x107   : > { %644 = vtanh.f32 %v319_v59 }
 0x111   : > { %v645_v60 = vpop.eup %644 }
 0x112   : > { %v321_v62 = vadd.f32 1.0, %v645_v60 }
 0x114   : > { %v322_v63 = vmul.f32 %v321_v62, %v314_v61 }
 0x116   : > { %583 = vmatmul.mubr.f32.vlgmr.msra.gmra.mrb[0].mxu1 %v322_v63 }
 0x1e9   : > { %v412_v1 = vpop.f32.mrb[0].mxu1 }
 0x1ea   : > { %v413_v2 = vadd.f32 %v478_v0, %v412_v1  ;;  %v584_v3 = vpop.f32.mrb[1].mxu1 }
 0x1ec   : > { %416 = vst [vmem:[%s219_s26] sm:$0xff] %v413_v2 }
 0x1ed PF: > { %s15_s18 = sadd.s32 1, %s652_s18  }
 0x1ee   : > { %p12_p4 = scmp.ge.s32.totalorder %s15_s18, 4  }
 0x1f0   :  { %14 = sbr.rel (!%p12_p4) target bundleno = 1 (0x1), region = 70 }

</bundles_post_ra>
